<compile_context>
chip_gen: v7x
topology: tpu7x:2x2x1
jax: 0.10.0
libtpu: 0.0.40
codegen_flags: <defaults>
</compile_context>

<pallas_src>
import math
from functools import partial

import jax
import jax.numpy as jnp
from jax.experimental import pallas as pl
from jax.experimental.pallas import tpu as pltpu


# ----------------------------- Pallas kernel -------------------------------

def _psinet_kernel(t_ref, z_ref, pk_ref, w2t_ref, out_ref, *, mxu_dtype):
    # t_ref, z_ref: (1, TN)   batch on lanes, dense
    # pk_ref:       (H, 8)    packed params:
    #                 [:,0]=w1_t  [:,1]=w1_z  [:,2]=b1  [:,3]=b2  [:,4]=w3
    #                 [0,5]=b3    [:,6:8]=padding
    # w2t_ref:      (H, H)    transposed layer-2 weights (out, in)
    # out_ref:      (1, TN)
    t_row = t_ref[...]                   # (1, TN)
    z_row = z_ref[...]                   # (1, TN)

    w1t = pk_ref[:, 0:1]                 # (H, 1)
    w1z = pk_ref[:, 1:2]                 # (H, 1)
    b1 = pk_ref[:, 2:3]                  # (H, 1)
    b2 = pk_ref[:, 3:4]                  # (H, 1)
    w3c = pk_ref[:, 4:5]                 # (H, 1)
    b3 = pk_ref[0:1, 5:6]                # (1, 1)

    # Layer 1 (in_dim=2): VPU broadcast multiply-adds, no MXU pass.
    h1 = jnp.tanh(w1t * t_row + w1z * z_row + b1)                   # (H, TN)

    # Layer 2 (H x H): feature-major MXU matmul, batch on lane/output axis.
    # bf16 operands / f32 accumulation by default.
    h2 = jnp.tanh(
        jnp.dot(w2t_ref[...].astype(mxu_dtype), h1.astype(mxu_dtype),
                preferred_element_type=jnp.float32)
        + b2)                                                       # (H, TN)

    # Layer 3 (H -> 1): VPU weighted product + XLU sublane reduction.
    # (Replaces a (1,H)@(H,TN) MXU pass that produced a single output row.)
    y = jnp.sum(h2 * w3c, axis=0, keepdims=True) + b3               # (1, TN)
    out_ref[...] = y.astype(out_ref.dtype)


def _round_up(x, m):
    return ((x + m - 1) // m) * m


def psinet_forward(t, z, params, *, tile_n=8192, mxu_dtype=jnp.bfloat16):
    """Fused MLP forward: psi(t, z) -> shape t.shape + (1,)."""
    w1, b1, w2, b2, w3, b3 = params        # w: (in, out), b: (1, out)

    t = jnp.asarray(t, jnp.float32)
    z = jnp.asarray(z, jnp.float32)
    t, z = jnp.broadcast_arrays(t, z)
    batch_shape = t.shape
    t = t.reshape(1, -1)                   # (1, N) lane-dense (reshape only)
    z = z.reshape(1, -1)
    n = t.shape[1]

    if n == 0:                             # degenerate empty batch guard
        return jnp.zeros(batch_shape + (1,), jnp.float32)

    hid = w1.shape[1]

    # Lane tile: large (amortizes ~0.35us/grid-step), 128-multiple, shrunk so
    # the grid keeps ~4 steps when N allows (feeds both v7x TensorCores).
    quarter = -(-n // 4)
    tile = min(tile_n, _round_up(quarter, 128))
    tile = max(128, _round_up(tile, 128))
    grid = (-(-n // tile),)                # ragged last block handled by Pallas

    # Pack all small per-feature parameters into one (H, 8) operand.
    stacked = jnp.stack(
        [w1[0], w1[1], b1.reshape(-1), b2.reshape(-1), w3.reshape(-1)],
        axis=1).astype(jnp.float32)                        # (H, 5)
    b3_col = jnp.zeros((hid, 1), jnp.float32).at[0, 0].set(jnp.reshape(b3, ()))
    packed = jnp.concatenate(
        [stacked, b3_col, jnp.zeros((hid, 2), jnp.float32)], axis=1)  # (H, 8)

    w2t = jnp.transpose(w2).astype(jnp.float32)            # (H_out, H_in)

    rep = lambda i: (0, 0)                 # params replicated per grid step

    cost = pl.CostEstimate(
        flops=int((2 * hid * hid + 2 * 2 * hid + 2 * hid) * n),
        transcendentals=int(2 * hid * n),
        bytes_accessed=int(12 * n + 4 * (hid * hid + 8 * hid)),
    )

    out = pl.pallas_call(
        partial(_psinet_kernel, mxu_dtype=mxu_dtype),
        out_shape=jax.ShapeDtypeStruct((1, n), jnp.float32),
        grid_spec=pltpu.PrefetchScalarGridSpec(
            num_scalar_prefetch=0,
            grid=grid,
            in_specs=[
                pl.BlockSpec((1, tile), lambda i: (0, i)),   # t
                pl.BlockSpec((1, tile), lambda i: (0, i)),   # z
                pl.BlockSpec((hid, 8), rep),                 # packed params
                pl.BlockSpec((hid, hid), rep),               # w2^T
            ],
            out_specs=pl.BlockSpec((1, tile), lambda i: (0, i)),
        ),
        compiler_params=pltpu.CompilerParams(
            dimension_semantics=("parallel",)),
        cost_estimate=cost,
    )(t, z, packed, w2t)

    return out[0].reshape(batch_shape + (1,))


# ------------------------- deterministic parameters -------------------------

def init_psinet_params(key, input_dim=2, hidden_dim=64, output_dim=1):
    """PyTorch-nn.Linear-style uniform init, weights stored as (in, out)."""
    ks = jax.random.split(key, 6)

    def linear(kw, kb, fan_in, fan_out):
        bound = 1.0 / math.sqrt(fan_in)
        w = jax.random.uniform(kw, (fan_in, fan_out), jnp.float32,
                               minval=-bound, maxval=bound)
        b = jax.random.uniform(kb, (1, fan_out), jnp.float32,
                               minval=-bound, maxval=bound)
        return w, b

    w1, b1 = linear(ks[0], ks[1], input_dim, hidden_dim)
    w2, b2 = linear(ks[2], ks[3], hidden_dim, hidden_dim)
    w3, b3 = linear(ks[4], ks[5], hidden_dim, output_dim)
    return (w1, b1, w2, b2, w3, b3)


# pure-JAX reference for correctness check
def psinet_ref(t, z, params):
    w1, b1, w2, b2, w3, b3 = params
    x = jnp.stack([t, z], axis=-1).astype(jnp.float32)
    h1 = jnp.tanh(x @ w1 + b1)
    h2 = jnp.tanh(h1 @ w2 + b2)
    return h2 @ w3 + b3


if __name__ == "__main__":
    key = jax.random.PRNGKey(0)
    k_params, k_inputs = jax.random.split(key, 2)

    params = init_psinet_params(k_params, input_dim=2, hidden_dim=64,
                                output_dim=1)

    # N=16  : tiny, < one lane group  -> exercises partial-lane output writes
    # N=1000: ragged multi-block grid -> exercises the masked last block
    for N in (16, 1000):
        kt, kz = jax.random.split(jax.random.fold_in(k_inputs, N), 2)
        t = jax.random.normal(kt, (N,), jnp.float32)
        z = jax.random.normal(kz, (N,), jnp.float32)

        ref = psinet_ref(t, z, params)

        # exact f32-MXU path: tight check against the pure-JAX reference
        out_f32 = jax.block_until_ready(
            psinet_forward(t, z, params, mxu_dtype=jnp.float32))
        assert out_f32.shape == (N, 1)
        assert jnp.allclose(out_f32, ref, atol=1e-5, rtol=1e-5), \
            "f32 path mismatch vs reference"

        # default bf16-operand / f32-accumulate path: looser tolerance
        out_bf16 = jax.block_until_ready(psinet_forward(t, z, params))
        assert out_bf16.shape == (N, 1)
        assert jnp.allclose(out_bf16, ref, atol=5e-2, rtol=0.0), \
            "bf16 path mismatch vs reference"

    print("KERNEL_OK")
</pallas_src>

<mosaic_0001>
module attributes {stable_mosaic.version = 11 : i64} {
  func.func @_psinet_kernel(%arg0: i32, %arg1: memref<1x128xf32, #tpu.memory_space<vmem>>, %arg2: memref<1x128xf32, #tpu.memory_space<vmem>>, %arg3: memref<64x8xf32, #tpu.memory_space<vmem>>, %arg4: memref<64x64xf32, #tpu.memory_space<vmem>>, %arg5: memref<1x128xf32, #tpu.memory_space<vmem>>) attributes {dimension_semantics = [#tpu.dimension_semantics<parallel>], iteration_bounds = array<i64: 1>, scalar_prefetch = 0 : i64, scratch_operands = 0 : i64, tpu.core_type = #tpu.core_type<tc>, window_params = [{transform_indices = @transform_0, window_bounds = array<i64: 1, 128>}, {transform_indices = @transform_1, window_bounds = array<i64: 1, 128>}, {pipeline_mode = #tpu.pipeline_mode<synchronous>, transform_indices = @transform_2, window_bounds = array<i64: 64, 8>}, {pipeline_mode = #tpu.pipeline_mode<synchronous>, transform_indices = @transform_3, window_bounds = array<i64: 64, 64>}, {transform_indices = @transform_4, window_bounds = array<i64: 1, 128>}]} {
    %c0 = arith.constant 0 : index
    %c0_0 = arith.constant 0 : index
    %0 = vector.load %arg1[%c0, %c0_0] : memref<1x128xf32, #tpu.memory_space<vmem>>, vector<1x128xf32>
    %c0_1 = arith.constant 0 : index
    %c0_2 = arith.constant 0 : index
    %1 = vector.load %arg2[%c0_1, %c0_2] : memref<1x128xf32, #tpu.memory_space<vmem>>, vector<1x128xf32>
    %c0_3 = arith.constant 0 : index
    %c0_4 = arith.constant 0 : index
    %2 = vector.load %arg3[%c0_3, %c0_4] : memref<64x8xf32, #tpu.memory_space<vmem>>, vector<64x1xf32>
    %c0_5 = arith.constant 0 : index
    %c1 = arith.constant 1 : index
    %3 = vector.load %arg3[%c0_5, %c1] : memref<64x8xf32, #tpu.memory_space<vmem>>, vector<64x1xf32>
    %c0_6 = arith.constant 0 : index
    %c2 = arith.constant 2 : index
    %4 = vector.load %arg3[%c0_6, %c2] : memref<64x8xf32, #tpu.memory_space<vmem>>, vector<64x1xf32>
    %c0_7 = arith.constant 0 : index
    %c3 = arith.constant 3 : index
    %5 = vector.load %arg3[%c0_7, %c3] : memref<64x8xf32, #tpu.memory_space<vmem>>, vector<64x1xf32>
    %c0_8 = arith.constant 0 : index
    %c4 = arith.constant 4 : index
    %6 = vector.load %arg3[%c0_8, %c4] : memref<64x8xf32, #tpu.memory_space<vmem>>, vector<64x1xf32>
    %c0_9 = arith.constant 0 : index
    %c5 = arith.constant 5 : index
    %7 = vector.load %arg3[%c0_9, %c5] : memref<64x8xf32, #tpu.memory_space<vmem>>, vector<1x1xf32>
    %8 = vector.broadcast %2 : vector<64x1xf32> to vector<64x128xf32>
    %9 = vector.broadcast %0 : vector<1x128xf32> to vector<64x128xf32>
    %10 = arith.mulf %8, %9 : vector<64x128xf32>
    %11 = vector.broadcast %3 : vector<64x1xf32> to vector<64x128xf32>
    %12 = vector.broadcast %1 : vector<1x128xf32> to vector<64x128xf32>
    %13 = arith.mulf %11, %12 : vector<64x128xf32>
    %14 = arith.addf %10, %13 : vector<64x128xf32>
    %15 = vector.broadcast %4 : vector<64x1xf32> to vector<64x128xf32>
    %16 = arith.addf %14, %15 : vector<64x128xf32>
    %17 = math.tanh %16 : vector<64x128xf32>
    %c0_10 = arith.constant 0 : index
    %c0_11 = arith.constant 0 : index
    %18 = vector.load %arg4[%c0_10, %c0_11] : memref<64x64xf32, #tpu.memory_space<vmem>>, vector<64x64xf32>
    %cst = arith.constant dense<0.000000e+00> : vector<64x128xf32>
    %19 = tpu.matmul %18, %17, %cst {dimension_numbers = #tpu.dot_dimension_numbers<[1], [0], [0], [1], [0, 0, 1, 1], [], []>} : vector<64x64xf32>, vector<64x128xf32>, vector<64x128xf32> -> vector<64x128xf32>
    %20 = vector.broadcast %5 : vector<64x1xf32> to vector<64x128xf32>
    %21 = arith.addf %19, %20 : vector<64x128xf32>
    %22 = math.tanh %21 : vector<64x128xf32>
    %23 = vector.broadcast %6 : vector<64x1xf32> to vector<64x128xf32>
    %24 = arith.mulf %22, %23 : vector<64x128xf32>
    %cst_12 = arith.constant dense<0.000000e+00> : vector<128xf32>
    %25 = vector.multi_reduction <add>, %24, %cst_12 [0] : vector<64x128xf32> to vector<128xf32>
    %26 = vector.shape_cast %25 : vector<128xf32> to vector<1x128xf32>
    %27 = vector.broadcast %7 : vector<1x1xf32> to vector<1x128xf32>
    %28 = arith.addf %26, %27 : vector<1x128xf32>
    %c0_13 = arith.constant 0 : index
    %c0_14 = arith.constant 0 : index
    %29 = vector.load %arg5[%c0_13, %c0_14] : memref<1x128xf32, #tpu.memory_space<vmem>>, vector<1x128xf32>
    tpu.vector_store %arg5[%c0_13, %c0_14], %28 {strides = array<i32>} : memref<1x128xf32, #tpu.memory_space<vmem>>, vector<1x128xf32>,
    return
  }
  func.func @transform_0(%arg0: i32) -> (i32, i32) {
    %c0_i32 = arith.constant 0 : i32
    %c0_i32_0 = arith.constant 0 : i32
    return %c0_i32, %arg0 : i32, i32
  }
  func.func @transform_1(%arg0: i32) -> (i32, i32) {
    %c0_i32 = arith.constant 0 : i32
    %c0_i32_0 = arith.constant 0 : i32
    return %c0_i32, %arg0 : i32, i32
  }
  func.func @transform_2(%arg0: i32) -> (i32, i32) {
    %c0_i32 = arith.constant 0 : i32
    %c0_i32_0 = arith.constant 0 : i32
    %c0_i32_1 = arith.constant 0 : i32
    return %c0_i32, %c0_i32_0 : i32, i32
  }
  func.func @transform_3(%arg0: i32) -> (i32, i32) {
    %c0_i32 = arith.constant 0 : i32
    %c0_i32_0 = arith.constant 0 : i32
    %c0_i32_1 = arith.constant 0 : i32
    return %c0_i32, %c0_i32_0 : i32, i32
  }
  func.func @transform_4(%arg0: i32) -> (i32, i32) {
    %c0_i32 = arith.constant 0 : i32
    %c0_i32_0 = arith.constant 0 : i32
    return %c0_i32, %arg0 : i32, i32
  }
}

</mosaic_0001>

<bundles_post_ra>
// kernel: tpu_custom_call.1
= control target key start
LH: loop header
LB: loop body
LE: loop exit
PB: predicated region body
PF: predicated region fallthrough
CT: control target
= control target key end

     0   :  { %v596_v1 = vmov 1   ;;  %v597_v2 = vmov 0   ;;  %s722_s0 = inlined_call_operand.vmem [shape: f32[1,16], index: 0, kind: input, shape index: {}]   ;;  %s723_s1 = inlined_call_operand.vmem [shape: f32[1,16], index: 1, kind: input, shape index: {}]   ;;  %s724_s2 = inlined_call_operand.vmem [shape: f32[64,8], index: 2, kind: input, shape index: {}]   ;;  %s725_s3 = inlined_call_operand.vmem [shape: f32[64,64], index: 3, kind: input, shape index: {}]   ;;  %s726_s4 = inlined_call_operand.hbm [shape: f32[1,16], index: 4, kind: output, shape index: {}]  }
   0x1   :  { %v631_v0 = vld [vmem:[%s724_s2] sm:$0xff]  ;;  %523 = vset.pattern.permute.xlu1 %v596_v1  ;;  %522 = vset.pattern.permute.xlu0 %v597_v2  ;;  %v21_v3 = vld [vmem:[%s724_s2 + $0x8] sm:$0xff] }
   0x2   :  { %84 = vperm.xlu1 %523, %v631_v0   ;;  %31 = vperm.xlu0 %522, %v631_v0  }
   0x3   :  { %9 = vsyncpa [#allocation3], 0  ;;  %v22_v4 = vld [vmem:[%s724_s2 + $0x10] sm:$0xff]  ;;  %v23_v5 = vld [vmem:[%s724_s2 + $0x18] sm:$0xff]  ;;  %v598_v7 = vmov 2   ;;  %vm225_vm0 = vcmask 523264  }
   0x4   :  { %v24_v6 = vld [vmem:[%s724_s2 + $0x20] sm:$0xff]  ;;  %v26_v8 = vld [vmem:[%s724_s2 + $0x30] sm:$0xff]  ;;  %v25_v9 = vld [vmem:[%s724_s2 + $0x28] sm:$0xff]  ;;  %v599_v13 = vmov 3   ;;  %v600_v14 = vmov 4   ;;  %v601_v16 = vmov 5  }
   0x5   :  { %v27_v10 = vld [vmem:[%s724_s2 + $0x38] sm:$0xff]  ;;  %v185_v11 = vld [vmem:[%s725_s3] sm:$0xff] }
   0x6   :  { %88 = vperm.xlu1 %523, %v21_v3   ;;  %36 = vperm.xlu0 %522, %v21_v3   ;;  %v189_v12 = vld [vmem:[%s725_s3 + $0x20] sm:$0xff] }
   0x7   :  { %479 = vmatprep.mubr.msk.f32.mxu0 %vm225_vm0, %v185_v11  ;;  %485 = vmatprep.mubr.msk.f32.mxu1 %vm225_vm0, %v189_v12  ;;  %v28_v15 = vld [vmem:[%s724_s2] sm:$0x1] }
   0x8   :  { %v438_v25 = vld [vmem:[%s723_s1] ss:$0 sm:$0xff] }
   0x9   :  { %v676_v26 = vld [vmem:[%s722_s0] ss:$0 sm:$0xff] }
   0xa   :  { %524 = vset.pattern.permute.xlu1 %v597_v2  ;;  %41 = vperm.xlu0 %522, %v22_v4  }
   0xb   :  { %46 = vperm.xlu1 %524, %v23_v5  }
   0xe   :  { %525 = vset.pattern.permute.xlu0 %v596_v1 }
   0xf   :  { %526 = vset.pattern.permute.xlu1 %v596_v1  ;;  %92 = vperm.xlu0 %525, %v22_v4  }
  0x10   :  { %96 = vperm.xlu1 %526, %v23_v5  }
  0x13   :  { %100 = vperm.xlu0 %525, %v24_v6  }
  0x14   :  { %527 = vset.pattern.permute.xlu1 %v598_v7 }
  0x15   :  { %138 = vperm.xlu1 %527, %v631_v0  }
  0x17   :  { %108 = vperm.xlu0 %525, %v26_v8  }
  0x19   :  { %528 = vset.pattern.permute.xlu1 %v597_v2 }
  0x1a   :  { %51 = vperm.xlu1 %528, %v24_v6  }
  0x1b   :  { %532 = vset.pattern.permute.xlu0 %v598_v7 }
  0x1c   :  { %142 = vperm.xlu0 %532, %v21_v3  }
  0x1e   :  { %56 = vperm.xlu1 %528, %v25_v9  }
  0x20   :  { %150 = vperm.xlu0 %532, %v23_v5  }
  0x22   :  { %529 = vset.pattern.permute.xlu1 %v596_v1 }
  0x23   :  { %104 = vperm.xlu1 %529, %v25_v9  }
  0x24   :  { %158 = vperm.xlu0 %532, %v25_v9  }
  0x27   :  { %530 = vset.pattern.permute.xlu1 %v598_v7 }
  0x28   :  { %146 = vperm.xlu1 %530, %v22_v4   ;;  %535 = vset.pattern.permute.xlu0 %v599_v13 }
  0x29   :  { %194 = vperm.xlu0 %535, %v631_v0  }
  0x2c   :  { %531 = vset.pattern.permute.xlu1 %v597_v2 }
  0x2d   :  { %61 = vperm.xlu1 %531, %v26_v8   ;;  %206 = vperm.xlu0 %535, %v23_v5  }
  0x31   :  { %66 = vperm.xlu1 %531, %v27_v10   ;;  %214 = vperm.xlu0 %535, %v25_v9  }
  0x35   :  { %533 = vset.pattern.permute.xlu1 %v596_v1  ;;  %222 = vperm.xlu0 %535, %v27_v10  }
  0x36   :  { %112 = vperm.xlu1 %533, %v27_v10  }
  0x39   :  { %538 = vset.pattern.permute.xlu0 %v600_v14 }
  0x3a   :  { %534 = vset.pattern.permute.xlu1 %v598_v7  ;;  %368 = vperm.xlu0 %538, %v21_v3  }
  0x3b   :  { %154 = vperm.xlu1 %534, %v24_v6  }
  0x3e   :  { %380 = vperm.xlu0 %538, %v24_v6  }
  0x3f   :  { %162 = vperm.xlu1 %534, %v26_v8  }
  0x42   :  { %388 = vperm.xlu0 %538, %v26_v8  }
  0x43   :  { %166 = vperm.xlu1 %534, %v27_v10  }
  0x46   :  { %539 = vset.pattern.permute.xlu0 %v601_v16 }
  0x47   :  { %536 = vset.pattern.permute.xlu1 %v599_v13  ;;  %418 = vperm.xlu0 %539, %v28_v15  }
  0x48   :  { %198 = vperm.xlu1 %536, %v21_v3  }
  0x4c   :  { %202 = vperm.xlu1 %536, %v22_v4  }
  0x50   :  { %210 = vperm.xlu1 %536, %v24_v6  }
  0x54   :  { %218 = vperm.xlu1 %536, %v26_v8  }
  0x58   :  { %537 = vset.pattern.permute.xlu1 %v600_v14 }
  0x59   :  { %364 = vperm.xlu1 %537, %v631_v0  }
  0x5d   :  { %372 = vperm.xlu1 %537, %v22_v4  }
  0x61   :  { %376 = vperm.xlu1 %537, %v23_v5  }
  0x65   :  { %384 = vperm.xlu1 %537, %v25_v9  }
  0x69   :  { %392 = vperm.xlu1 %537, %v27_v10  }
  0x81   :  { %v85_v17 = vpop.permute.xlu1 %84  ;;  %v32_v18 = vpop.permute.xlu0 %31 }
  0x82   :  { %v121_v28 = vmul.f32 %v438_v25, %v85_v17  ;;  %v75_v29 = vmul.f32 %v676_v26, %v32_v18 }
  0x84   :  { %v129_v34 = vadd.f32 %v121_v28, %v75_v29  ;;  %v192_v28 = vld [vmem:[%s725_s3 + $0x38] sm:$0xff] }
  0x85   :  { %v89_v19 = vpop.permute.xlu1 %88  ;;  %v37_v20 = vpop.permute.xlu0 %36 }
  0x86   :  { %v122_v31 = vmul.f32 %v438_v25, %v89_v19  ;;  %v76_v32 = vmul.f32 %v676_v26, %v37_v20 }
  0x88   :  { %v130_v37 = vadd.f32 %v122_v31, %v76_v32 }
  0x89   :  { %v42_v21 = vpop.permute.xlu0 %41 }
  0x8a   :  { %v47_v22 = vpop.permute.xlu1 %46  ;;  %v77_v43 = vmul.f32 %v676_v26, %v42_v21 }
  0x8b   :  { %v78_v42 = vmul.f32 %v676_v26, %v47_v22 }
  0x8e   :  { %v93_v23 = vpop.permute.xlu0 %92 }
  0x8f   :  { %v97_v24 = vpop.permute.xlu1 %96  ;;  %v123_v44 = vmul.f32 %v438_v25, %v93_v23  ;;  %v186_v23 = vld [vmem:[%s725_s3 + $0x8] sm:$0xff] }
  0x90   :  { %v124_v41 = vmul.f32 %v438_v25, %v97_v24  ;;  %v190_v24 = vld [vmem:[%s725_s3 + $0x28] sm:$0xff] }
  0x91   :  { %v131_v49 = vadd.f32 %v123_v44, %v77_v43 }
  0x92   :  { %v101_v27 = vpop.permute.xlu0 %100  ;;  %v132_v47 = vadd.f32 %v124_v41, %v78_v42 }
  0x93   :  { %v125_v62 = vmul.f32 %v438_v25, %v101_v27  ;;  %v188_v27 = vld [vmem:[%s725_s3 + $0x18] sm:$0xff] }
  0x94   :  { %v139_v30 = vpop.permute.xlu1 %138 }
  0x95   :  { %v169_v35 = vadd.f32 %v139_v30, %v129_v34 }
  0x96   :  { %v109_v33 = vpop.permute.xlu0 %108 }
  0x97   :  { %540 = vtanh.f32 %v169_v35  ;;  %v127_v8 = vmul.f32 %v438_v25, %v109_v33 }
  0x99   :  { %v52_v36 = vpop.permute.xlu1 %51 }
  0x9a   :  { %v79_v63 = vmul.f32 %v676_v26, %v52_v36 }
  0x9b   :  { %v143_v38 = vpop.permute.xlu0 %142 }
  0x9c   :  { %v170_v39 = vadd.f32 %v143_v38, %v130_v37  ;;  %v133_v4 = vadd.f32 %v125_v62, %v79_v63 }
  0x9d   :  { %v57_v40 = vpop.permute.xlu1 %56 }
  0x9e   :  { %542 = vtanh.f32 %v170_v39  ;;  %v80_v58 = vmul.f32 %v676_v26, %v57_v40 }
  0x9f   :  { %v151_v45 = vpop.permute.xlu0 %150 }
  0xa0   :  { %v172_v48 = vadd.f32 %v151_v45, %v132_v47 }
  0xa1   :  { %v541_v50 = vpop.eup %540 }
  0xa2   :  { %v105_v46 = vpop.permute.xlu1 %104  ;;  %544 = vtanh.f32 %v172_v48 }
  0xa3   :  { %v126_v56 = vmul.f32 %v438_v25, %v105_v46  ;;  %v159_v0 = vpop.permute.xlu0 %158 }
  0xa5   :  { %v134_v61 = vadd.f32 %v126_v56, %v80_v58 }
  0xa7   :  { %v147_v51 = vpop.permute.xlu1 %146  ;;  %v174_v3 = vadd.f32 %v159_v0, %v134_v61 }
  0xa8   :  { %v543_v52 = vpop.eup %542  ;;  %v171_v53 = vadd.f32 %v147_v51, %v131_v49  ;;  %v195_v31 = vpop.permute.xlu0 %194 }
  0xa9   :  { %v491_v54 = vpack.c.bf16 %v543_v52, %v541_v50 }
  0xaa   :  { %546 = vtanh.f32 %v171_v53 }
  0xab   :  { %492 = vmatprep.subr.bf16.mxu0 %v491_v54  ;;  %507 = vmatprep.subr.bf16.mxu1 %v491_v54  ;;  %548 = vtanh.f32 %v174_v3 }
  0xac   :  { %v62_v55 = vpop.permute.xlu1 %61  ;;  %494 = vmatpush3.bf16.msra.mxu0 %v491_v54  ;;  %511 = vmatpush3.bf16.msra.mxu1 %v491_v54  ;;  %v545_v59 = vpop.eup %544 }
  0xad   :  { %v81_v5 = vmul.f32 %v676_v26, %v62_v55  ;;  %v207_v33 = vpop.permute.xlu0 %206 }
  0xaf   :  { %v135_v11 = vadd.f32 %v127_v8, %v81_v5 }
  0xb0   :  { %v67_v57 = vpop.permute.xlu1 %66 }
  0xb1   :  { %v82_v12 = vmul.f32 %v676_v26, %v67_v57  ;;  %v191_v26 = vld [vmem:[%s725_s3 + $0x30] sm:$0xff]  ;;  %v215_v41 = vpop.permute.xlu0 %214 }
  0xb4   :  { %v547_v60 = vpop.eup %546 }
  0xb5   :  { %v113_v1 = vpop.permute.xlu1 %112  ;;  %v495_v2 = vpack.c.bf16 %v545_v59, %v547_v60  ;;  %v549_v17 = vpop.eup %548 }
  0xb6   :  { %v128_v9 = vmul.f32 %v438_v25, %v113_v1  ;;  %v187_v25 = vld [vmem:[%s725_s3 + $0x10] sm:$0xff]  ;;  %v223_v50 = vpop.permute.xlu0 %222  ;;  %s602_s3 = smov [#allocation2]  }
  0xb7   :  { %496 = vmatprep.subr.bf16.mxu0 %v495_v2  ;;  %508 = vmatprep.subr.bf16.mxu1 %v495_v2  ;;  %s429_s24 = sshll.u32 %s602_s3, 4  ;;  %s430_s24 = int_to_ptr.vmem [resolvable:$true] %s429_s24 }
  0xb8   :  { %498 = vmatpush3.bf16.msra.mxu0 %v495_v2  ;;  %512 = vmatpush3.bf16.msra.mxu1 %v495_v2  ;;  %v136_v14 = vadd.f32 %v128_v9, %v82_v12  ;;  %s572_s25 = scalar_lea.vmem %s430_s24, 16  ;;  %s576_s26 = scalar_lea.vmem %s430_s24, 32 }
  0xb9   :  { %p573_p0 = scmp.ne.s32.totalorder %s430_s24, %s572_s25  ;;  %p577_p1 = scmp.lt.s32.totalorder %s430_s24, %s430_s24 }
  0xba   :  { %v155_v6 = vpop.permute.xlu1 %154  ;;  %v369_v56 = vpop.permute.xlu0 %368  ;;  %p578_p2 = scmp.lt.s32.totalorder %s576_s26, %s572_s25 }
  0xbb   :  { %v173_v7 = vadd.f32 %v155_v6, %v133_v4 }
  0xbc   :  { %p579_p3 = por %p578_p2, %p577_p1 }
  0xbd   :  { %550 = vtanh.f32 %v173_v7 }
  0xbe   :  { %v163_v10 = vpop.permute.xlu1 %162  ;;  %v381_v2 = vpop.permute.xlu0 %380  ;;  %p580_p4 = pnand %p579_p3, %p573_p0 }
  0xbf   :  { %v175_v13 = vadd.f32 %v163_v10, %v135_v11 }
  0xc1   :  { %552 = vtanh.f32 %v175_v13 }
  0xc2   :  { %v167_v15 = vpop.permute.xlu1 %166  ;;  %v389_v13 = vpop.permute.xlu0 %388 }
  0xc3   :  { %v176_v16 = vadd.f32 %v167_v15, %v136_v14 }
  0xc5   :  { %554 = vtanh.f32 %v176_v16 }
  0xc7   :  { %v551_v18 = vpop.eup %550  ;;  %v199_v29 = vpop.permute.xlu1 %198 }
  0xc8   :  { %v499_v19 = vpack.c.bf16 %v549_v17, %v551_v18 }
  0xca   :  { %500 = vmatprep.subr.bf16.mxu0 %v499_v19  ;;  %509 = vmatprep.subr.bf16.mxu1 %v499_v19 }
  0xcb   :  { %502 = vmatpush3.bf16.msra.mxu0 %v499_v19  ;;  %513 = vmatpush3.bf16.msra.mxu1 %v499_v19  ;;  %v553_v20 = vpop.eup %552  ;;  %v203_v30 = vpop.permute.xlu1 %202 }
  0xcf   :  { %v555_v21 = vpop.eup %554  ;;  %v211_v32 = vpop.permute.xlu1 %210 }
  0xd0   :  { %v503_v22 = vpack.c.bf16 %v555_v21, %v553_v20 }
  0xd2   :  { %504 = vmatprep.subr.bf16.mxu0 %v503_v22  ;;  %510 = vmatprep.subr.bf16.mxu1 %v503_v22 }
  0xd3   :  { %506 = vmatpush3.bf16.msra.mxu0 %v503_v22  ;;  %514 = vmatpush3.bf16.msra.mxu1 %v503_v22  ;;  %v219_v34 = vpop.permute.xlu1 %218 }
  0xd6   :  { %480 = vmatmul.mubr.msk.f32.vlgmr.msra.gmra.mrb[0].mxu0 %vm225_vm0, %v186_v23  ;;  %486 = vmatmul.mubr.msk.f32.vlgmr.msra.gmra.mrb[0].mxu1 %vm225_vm0, %v190_v24 }
  0xd7   :  { %482 = vmatprep.mubr.msk.f32.mxu0 %vm225_vm0, %v187_v25  ;;  %488 = vmatprep.mubr.msk.f32.mxu1 %vm225_vm0, %v191_v26  ;;  %v419_v25 = vpop.permute.xlu0 %418 }
  0xd8   :  { %v365_v42 = vpop.permute.xlu1 %364 }
  0xda   :  { %483 = vmatmul.mubr.msk.f32.gmra.mrb[2].mxu0 %vm225_vm0, %v188_v27  ;;  %489 = vmatmul.mubr.msk.f32.gmra.mrb[2].mxu1 %vm225_vm0, %v192_v28 }
  0xdc   :  { %v373_v52 = vpop.permute.xlu1 %372 }
  0xe0   :  { %v377_v60 = vpop.permute.xlu1 %376 }
  0xe4   :  { %v385_v6 = vpop.permute.xlu1 %384 }
  0xe8   :  { %v393_v16 = vpop.permute.xlu1 %392 }
 0x1a9   :  { %v481_v35 = vpop.f32.mrb[0].mxu0  ;;  %v487_v36 = vpop.f32.mrb[0].mxu1 }
 0x1aa   :  { %v322_v37 = vadd.f32 %v481_v35, %v199_v29  ;;  %v316_v38 = vpop.f32.mrb[1].mxu0  ;;  %v336_v39 = vpop.f32.mrb[1].mxu1  ;;  %v342_v51 = vadd.f32 %v487_v36, %v215_v41 }
 0x1ab   :  { %v317_v40 = vadd.f32 %v316_v38, %v195_v31  ;;  %v337_v49 = vadd.f32 %v336_v39, %v211_v32 }
 0x1ac   :  { %556 = vtanh.f32 %v322_v37 }
 0x1ad   :  { %v484_v43 = vpop.f32.mrb[2].mxu0  ;;  %v490_v44 = vpop.f32.mrb[2].mxu1  ;;  %558 = vtanh.f32 %v317_v40 }
 0x1ae   :  { %v332_v45 = vadd.f32 %v484_v43, %v207_v33  ;;  %v326_v46 = vpop.f32.mrb[3].mxu0  ;;  %v346_v47 = vpop.f32.mrb[3].mxu1  ;;  %v352_v55 = vadd.f32 %v490_v44, %v223_v50 }
 0x1af   :  { %v327_v48 = vadd.f32 %v326_v46, %v203_v30  ;;  %v347_v53 = vadd.f32 %v346_v47, %v219_v34 }
 0x1b0   :  { %560 = vtanh.f32 %v332_v45 }
 0x1b1   :  { %562 = vtanh.f32 %v327_v48 }
 0x1b2   :  { %564 = vtanh.f32 %v337_v49 }
 0x1b3   :  { %566 = vtanh.f32 %v342_v51 }
 0x1b4   :  { %568 = vtanh.f32 %v347_v53 }
 0x1b5   :  { %570 = vtanh.f32 %v352_v55 }
 0x1b6   :  { %v557_v54 = vpop.eup %556 }
 0x1b7   :  { %v396_v57 = vmul.f32 %v557_v54, %v369_v56  ;;  %v559_v58 = vpop.eup %558 }
 0x1b8   :  { %v395_v59 = vmul.f32 %v559_v58, %v365_v42 }
 0x1ba   :  { %v561_v61 = vpop.eup %560  ;;  %v403_v62 = vadd.f32 %v396_v57, %v395_v59 }
 0x1bb   :  { %v563_v63 = vpop.eup %562  ;;  %v398_v4 = vmul.f32 %v561_v61, %v377_v60 }
 0x1bc   :  { %v397_v0 = vmul.f32 %v563_v63, %v373_v52  ;;  %v565_v1 = vpop.eup %564 }
 0x1bd   :  { %v567_v5 = vpop.eup %566  ;;  %v399_v7 = vmul.f32 %v565_v1, %v381_v2 }
 0x1be   :  { %v404_v3 = vadd.f32 %v403_v62, %v397_v0  ;;  %v569_v9 = vpop.eup %568  ;;  %v400_v10 = vmul.f32 %v567_v5, %v385_v6 }
 0x1bf   :  { %v571_v12 = vpop.eup %570  ;;  %v401_v14 = vmul.f32 %v569_v9, %v389_v13 }
 0x1c0   :  { %v405_v8 = vadd.f32 %v404_v3, %v398_v4  ;;  %v402_v17 = vmul.f32 %v571_v12, %v393_v16 }
 0x1c2   :  { %v406_v11 = vadd.f32 %v405_v8, %v399_v7 }
 0x1c4   :  { %v407_v15 = vadd.f32 %v406_v11, %v400_v10 }
 0x1c6   :  { %v408_v18 = vadd.f32 %v407_v15, %v401_v14 }
 0x1c8   :  { %v409_v19 = vadd.f32 %v408_v18, %v402_v17 }
 0x1ca   :  { %v410_v20 = vrot.slane %v409_v19, 4 }
 0x1cc   :  { %v411_v21 = vadd.f32 %v410_v20, %v409_v19 }
 0x1ce   :  { %v412_v22 = vrot.slane %v411_v21, 2 }
 0x1d0   :  { %v413_v23 = vadd.f32 %v412_v22, %v411_v21 }
 0x1d2   :  { %v414_v24 = vrot.slane %v413_v23, 1 }
 0x1d4   :  { %v415_v26 = vadd.f32 %v414_v24, %v413_v23 }
 0x1d6   :  { %v421_v27 = vadd.f32 %v419_v25, %v415_v26 }
 0x1d8   :  { %422 = vst [vmem:[#allocation2] sm:$0x1] %v421_v27 }
 0x1d9   :  { %583 = shalt.err (!%p580_p4)
}
 0x1da   :  { %s584_s29 = scalar_lea.hbm %s726_s4, 16 }
 0x1db   :  { %p585_p5 = scmp.ne.s32.totalorder %s726_s4, %s584_s29  ;;  %p588_p6 = scmp.lt.u32.totalorder %s584_s29, %s726_s4 }
 0x1dd   :  { %p590_p7 = pnand %p588_p6, %p585_p5 }
 0x1df   :  { %593 = shalt.err (!%p590_p7)
}
 0x1e0   :  { %432 = dma.vmem_to_hbm [thread:$0]  %s430_s24, 16, %s726_s4, [#allocation3]  }
 0x1e1   :  { %594 = dma.done.wait [#allocation3], 16  }
 0x1e2   :  { %595 = vsyncadd [#allocation3], 4294967280 }
 0x1e3   :  { %436 = vsyncpa [#allocation3], 1 }

</bundles_post_ra>
